<compile_context>
chip_gen: v7x
topology: tpu7x:2x2x1
jax: 0.10.0
libtpu: 0.0.40
codegen_flags: <defaults>
</compile_context>

<pallas_src>
import math

import jax
import jax.numpy as jnp
import numpy as np
from jax import lax
from jax.experimental import pallas as pl
from jax.experimental.pallas import tpu as pltpu

_S_TILE_MAX = 512          # max sublane-groups per grid step (=> 512*128 batch elems)
_CH = 8                    # sublane rows per inner step (1 f32 vreg per plane)
_UNROLL = 2                # inner steps per fori_loop iteration (manual unroll)
_GRANULE = _CH * _UNROLL   # S_TILE is always a multiple of this (16)
_MIN_PALLAS_BATCH = 2048   # below this, a fused XLA einsum is strictly faster


def _noise_kernel(c_ref, x_ref, o_ref):
    """One (8, S_TILE, 128) tile of the batched superoperator application.

    c_ref : SMEM (32,) f32 — Re (0..15) and Im (16..31) of C[i,j,m,n],
            flat index (i*2 + j)*4 + (m*2 + n).
    x_ref : VMEM (8, S_TILE, 128) f32 — rows 0..3 Re(rho[mn]), rows 4..7 Im(rho[mn]).
    o_ref : VMEM (8, S_TILE, 128) f32 — same layout for the output (i,j) planes.
    """
    s_tile = x_ref.shape[1]
    n_iters = s_tile // _GRANULE

    # Hoist the 32 superoperator scalars out of the loop (read SMEM once).
    c_re = [c_ref[idx] for idx in range(16)]
    c_im = [c_ref[16 + idx] for idx in range(16)]

    def process_chunk(sl):
        # One (_CH, 128) chunk per plane: 8 accumulator vregs + 2 input vregs.
        acc = [None] * 8            # 4 Re planes then 4 Im planes
        for m in range(2):
            for n in range(2):
                r = m * 2 + n
                r_re = x_ref[r, sl, :]          # (_CH, 128), dense vreg
                r_im = x_ref[4 + r, sl, :]
                for i in range(2):
                    for j in range(2):
                        o = i * 2 + j
                        cidx = o * 4 + r
                        cr = c_re[cidx]
                        ci = c_im[cidx]
                        t_re = cr * r_re - ci * r_im
                        t_im = cr * r_im + ci * r_re
                        acc[o] = t_re if acc[o] is None else acc[o] + t_re
                        acc[4 + o] = t_im if acc[4 + o] is None else acc[4 + o] + t_im
        for p in range(8):
            # Full (_CH, 128) aligned tile store -> unmasked vst.
            o_ref[p, sl, :] = acc[p]

    def body(it, carry):
        for u in range(_UNROLL):
            start = pl.multiple_of(it * _GRANULE + u * _CH, _CH)
            process_chunk(pl.ds(start, _CH))
        return carry

    # fori_loop bounds live ranges (a fully-unrolled Python loop would not).
    lax.fori_loop(0, n_iters, body, 0)


def _superoperator_scalars(K):
    """Batch-independent 4x4 complex superoperator, flattened to 32 f32 scalars."""
    C = jnp.einsum('imk,jnk->ijmn', K, jnp.conj(K))            # (2,2,2,2) complex
    return jnp.concatenate(
        [jnp.real(C).reshape(-1), jnp.imag(C).reshape(-1)]
    ).astype(jnp.float32)                                      # (32,)


def _noise_reference(K, rho):
    """Plain fused-XLA reference (also the small-batch fallback)."""
    return jnp.einsum('imk,...mn,jnk->...ij', K, rho, jnp.conj(K))


def noise_channel(K, rho, *, min_pallas_batch=_MIN_PALLAS_BATCH):
    """Pallas implementation of NoiseChannel.forward.

    K   : (2, 2, KN) complex64
    rho : (b, 2, 2) or (b, c, 2, 2) complex64
    """
    if rho.ndim == 3:
        batch_dims = rho.shape[:1]
    elif rho.ndim == 4:
        batch_dims = rho.shape[:2]
    else:
        raise ValueError(f"rho must be 3D or 4D, got ndim={rho.ndim}")
    B = int(math.prod(batch_dims))

    # Small-batch fallback: padding, layout plumbing and kernel launch dominate
    # at tiny B; one fused einsum is strictly faster.
    if B < min_pallas_batch:
        return _noise_reference(K, rho).astype(jnp.complex64)

    c_flat = _superoperator_scalars(K)

    # Batch layout: flatten batch onto (sublane-group S, lane 128); fuse Re/Im
    # of the 4 matrix entries into one 8-row plane.
    S = pl.cdiv(B, 128)
    S_units = pl.cdiv(S, _GRANULE)
    S_TILE = min(_S_TILE_MAX, S_units * _GRANULE)
    if S_units >= 2 and S_units * _GRANULE <= S_TILE:
        # Guarantee a >= 2-step grid so ("parallel",) can shard across the two
        # TensorCores on v7x (no effect on single-TC v5e/v6e).
        S_TILE = (S_units // 2) * _GRANULE
    S_pad = pl.cdiv(S, S_TILE) * S_TILE
    B_pad = S_pad * 128

    # Input plumbing: one complex transpose + one fused real/imag/concat/pad
    # pass producing the planar (8, S_pad, 128) slab.
    rho_t = jnp.transpose(rho.reshape(B, 4))                    # (4, B) complex
    planes = jnp.concatenate(
        [jnp.real(rho_t), jnp.imag(rho_t)], axis=0
    ).astype(jnp.float32)                                       # (8, B)
    planes = jnp.pad(planes, ((0, 0), (0, B_pad - B)))          # (8, B_pad)
    x = planes.reshape(8, S_pad, 128)

    grid = (S_pad // S_TILE,)
    out = pl.pallas_call(
        _noise_kernel,
        out_shape=jax.ShapeDtypeStruct((8, S_pad, 128), jnp.float32),
        grid=grid,
        in_specs=[
            pl.BlockSpec(memory_space=pltpu.MemorySpace.SMEM),
            pl.BlockSpec((8, S_TILE, 128), lambda t: (0, t, 0)),
        ],
        out_specs=pl.BlockSpec((8, S_TILE, 128), lambda t: (0, t, 0)),
        compiler_params=pltpu.CompilerParams(
            dimension_semantics=("parallel",)),
    )(c_flat, x)

    # Output glue: one fused complex-construct + one transpose pass.
    out = out.reshape(8, B_pad)[:, :B]                          # (8, B)
    out_c = lax.complex(out[:4], out[4:])                       # (4, B) complex64
    return jnp.transpose(out_c).reshape(*batch_dims, 2, 2)


if __name__ == "__main__":
    key = jax.random.PRNGKey(0)
    kr, ki, r4r, r4i, r3r, r3i, rbr, rbi = jax.random.split(key, 8)

    # Parameter: K has shape (2, 2, 1) complex64 (as in __init__).  The module
    # zero-initializes it (which would make the test trivial), so we fill it
    # deterministically with random values instead.
    K = (jax.random.normal(kr, (2, 2, 1), dtype=jnp.float32)
         + 1j * jax.random.normal(ki, (2, 2, 1), dtype=jnp.float32)
         ).astype(jnp.complex64)

    # Small shapes consistent with the module: (b, c, 2, 2) and (b, 2, 2).
    rho4 = (jax.random.normal(r4r, (2, 4, 2, 2), dtype=jnp.float32)
            + 1j * jax.random.normal(r4i, (2, 4, 2, 2), dtype=jnp.float32)
            ).astype(jnp.complex64)
    rho3 = (jax.random.normal(r3r, (2, 2, 2), dtype=jnp.float32)
            + 1j * jax.random.normal(r3i, (2, 2, 2), dtype=jnp.float32)
            ).astype(jnp.complex64)
    # Medium batch (B = 4*2048 = 8192) to exercise the Pallas path with a
    # 2-step grid; still tiny (~256 KiB of density matrices).
    rho_big = (jax.random.normal(rbr, (4, 2048, 2, 2), dtype=jnp.float32)
               + 1j * jax.random.normal(rbi, (4, 2048, 2, 2), dtype=jnp.float32)
               ).astype(jnp.complex64)

    # Small shapes: fused-einsum fallback path (default threshold).
    out4 = jax.block_until_ready(noise_channel(K, rho4))
    out3 = jax.block_until_ready(noise_channel(K, rho3))
    # Same small shapes forced through the Pallas kernel (edge-case check).
    out4_k = jax.block_until_ready(noise_channel(K, rho4, min_pallas_batch=0))
    out3_k = jax.block_until_ready(noise_channel(K, rho3, min_pallas_batch=0))
    # Medium batch through the Pallas kernel (default threshold).
    out_big = jax.block_until_ready(noise_channel(K, rho_big))

    ref4 = _noise_reference(K, rho4)
    ref3 = _noise_reference(K, rho3)
    ref_big = _noise_reference(K, rho_big)

    np.testing.assert_allclose(np.asarray(out4), np.asarray(ref4),
                               rtol=1e-5, atol=1e-5)
    np.testing.assert_allclose(np.asarray(out3), np.asarray(ref3),
                               rtol=1e-5, atol=1e-5)
    np.testing.assert_allclose(np.asarray(out4_k), np.asarray(ref4),
                               rtol=1e-5, atol=1e-5)
    np.testing.assert_allclose(np.asarray(out3_k), np.asarray(ref3),
                               rtol=1e-5, atol=1e-5)
    np.testing.assert_allclose(np.asarray(out_big), np.asarray(ref_big),
                               rtol=1e-5, atol=1e-5)

    print("KERNEL_OK")
</pallas_src>

<mosaic_0001>
module attributes {stable_mosaic.version = 11 : i64} {
  func.func @_noise_kernel(%arg0: i32, %arg1: memref<32xf32, #tpu.memory_space<smem>>, %arg2: memref<8x16x128xf32, #tpu.memory_space<vmem>>, %arg3: memref<8x16x128xf32, #tpu.memory_space<vmem>>) attributes {dimension_semantics = [#tpu.dimension_semantics<parallel>], iteration_bounds = array<i64: 1>, scalar_prefetch = 0 : i64, scratch_operands = 0 : i64, tpu.core_type = #tpu.core_type<tc>, window_params = [{transform_indices = @transform_0, window_bounds = array<i64: 32>}, {transform_indices = @transform_1, window_bounds = array<i64: 8, 16, 128>}, {transform_indices = @transform_2, window_bounds = array<i64: 8, 16, 128>}]} {
    %c0 = arith.constant 0 : index
    %0 = memref.load %arg1[%c0] : memref<32xf32, #tpu.memory_space<smem>>
    %c1 = arith.constant 1 : index
    %1 = memref.load %arg1[%c1] : memref<32xf32, #tpu.memory_space<smem>>
    %c2 = arith.constant 2 : index
    %2 = memref.load %arg1[%c2] : memref<32xf32, #tpu.memory_space<smem>>
    %c3 = arith.constant 3 : index
    %3 = memref.load %arg1[%c3] : memref<32xf32, #tpu.memory_space<smem>>
    %c4 = arith.constant 4 : index
    %4 = memref.load %arg1[%c4] : memref<32xf32, #tpu.memory_space<smem>>
    %c5 = arith.constant 5 : index
    %5 = memref.load %arg1[%c5] : memref<32xf32, #tpu.memory_space<smem>>
    %c6 = arith.constant 6 : index
    %6 = memref.load %arg1[%c6] : memref<32xf32, #tpu.memory_space<smem>>
    %c7 = arith.constant 7 : index
    %7 = memref.load %arg1[%c7] : memref<32xf32, #tpu.memory_space<smem>>
    %c8 = arith.constant 8 : index
    %8 = memref.load %arg1[%c8] : memref<32xf32, #tpu.memory_space<smem>>
    %c9 = arith.constant 9 : index
    %9 = memref.load %arg1[%c9] : memref<32xf32, #tpu.memory_space<smem>>
    %c10 = arith.constant 10 : index
    %10 = memref.load %arg1[%c10] : memref<32xf32, #tpu.memory_space<smem>>
    %c11 = arith.constant 11 : index
    %11 = memref.load %arg1[%c11] : memref<32xf32, #tpu.memory_space<smem>>
    %c12 = arith.constant 12 : index
    %12 = memref.load %arg1[%c12] : memref<32xf32, #tpu.memory_space<smem>>
    %c13 = arith.constant 13 : index
    %13 = memref.load %arg1[%c13] : memref<32xf32, #tpu.memory_space<smem>>
    %c14 = arith.constant 14 : index
    %14 = memref.load %arg1[%c14] : memref<32xf32, #tpu.memory_space<smem>>
    %c15 = arith.constant 15 : index
    %15 = memref.load %arg1[%c15] : memref<32xf32, #tpu.memory_space<smem>>
    %c16 = arith.constant 16 : index
    %16 = memref.load %arg1[%c16] : memref<32xf32, #tpu.memory_space<smem>>
    %c17 = arith.constant 17 : index
    %17 = memref.load %arg1[%c17] : memref<32xf32, #tpu.memory_space<smem>>
    %c18 = arith.constant 18 : index
    %18 = memref.load %arg1[%c18] : memref<32xf32, #tpu.memory_space<smem>>
    %c19 = arith.constant 19 : index
    %19 = memref.load %arg1[%c19] : memref<32xf32, #tpu.memory_space<smem>>
    %c20 = arith.constant 20 : index
    %20 = memref.load %arg1[%c20] : memref<32xf32, #tpu.memory_space<smem>>
    %c21 = arith.constant 21 : index
    %21 = memref.load %arg1[%c21] : memref<32xf32, #tpu.memory_space<smem>>
    %c22 = arith.constant 22 : index
    %22 = memref.load %arg1[%c22] : memref<32xf32, #tpu.memory_space<smem>>
    %c23 = arith.constant 23 : index
    %23 = memref.load %arg1[%c23] : memref<32xf32, #tpu.memory_space<smem>>
    %c24 = arith.constant 24 : index
    %24 = memref.load %arg1[%c24] : memref<32xf32, #tpu.memory_space<smem>>
    %c25 = arith.constant 25 : index
    %25 = memref.load %arg1[%c25] : memref<32xf32, #tpu.memory_space<smem>>
    %c26 = arith.constant 26 : index
    %26 = memref.load %arg1[%c26] : memref<32xf32, #tpu.memory_space<smem>>
    %c27 = arith.constant 27 : index
    %27 = memref.load %arg1[%c27] : memref<32xf32, #tpu.memory_space<smem>>
    %c28 = arith.constant 28 : index
    %28 = memref.load %arg1[%c28] : memref<32xf32, #tpu.memory_space<smem>>
    %c29 = arith.constant 29 : index
    %29 = memref.load %arg1[%c29] : memref<32xf32, #tpu.memory_space<smem>>
    %c30 = arith.constant 30 : index
    %30 = memref.load %arg1[%c30] : memref<32xf32, #tpu.memory_space<smem>>
    %c31 = arith.constant 31 : index
    %31 = memref.load %arg1[%c31] : memref<32xf32, #tpu.memory_space<smem>>
    %c0_i32 = arith.constant 0 : i32
    %c16_i32 = arith.constant 16 : i32
    %32 = arith.muli %c0_i32, %c16_i32 : i32
    %c0_i32_0 = arith.constant 0 : i32
    %33 = arith.addi %32, %c0_i32_0 : i32
    %34 = tpu.assume_multiple %33, 8 : i32
    %c0_1 = arith.constant 0 : index
    %35 = arith.index_cast %34 : i32 to index
    %c0_2 = arith.constant 0 : index
    %36 = vector.load %arg2[%c0_1, %35, %c0_2] : memref<8x16x128xf32, #tpu.memory_space<vmem>>, vector<1x8x128xf32>
    %37 = vector.shape_cast %36 : vector<1x8x128xf32> to vector<8x128xf32>
    %c4_3 = arith.constant 4 : index
    %38 = arith.index_cast %34 : i32 to index
    %c0_4 = arith.constant 0 : index
    %39 = vector.load %arg2[%c4_3, %38, %c0_4] : memref<8x16x128xf32, #tpu.memory_space<vmem>>, vector<1x8x128xf32>
    %40 = vector.shape_cast %39 : vector<1x8x128xf32> to vector<8x128xf32>
    %41 = vector.broadcast %0 : f32 to vector<8x128xf32>
    %42 = arith.mulf %41, %37 : vector<8x128xf32>
    %43 = vector.broadcast %16 : f32 to vector<8x128xf32>
    %44 = arith.mulf %43, %40 : vector<8x128xf32>
    %45 = arith.subf %42, %44 : vector<8x128xf32>
    %46 = vector.broadcast %0 : f32 to vector<8x128xf32>
    %47 = arith.mulf %46, %40 : vector<8x128xf32>
    %48 = vector.broadcast %16 : f32 to vector<8x128xf32>
    %49 = arith.mulf %48, %37 : vector<8x128xf32>
    %50 = arith.addf %47, %49 : vector<8x128xf32>
    %51 = vector.broadcast %4 : f32 to vector<8x128xf32>
    %52 = arith.mulf %51, %37 : vector<8x128xf32>
    %53 = vector.broadcast %20 : f32 to vector<8x128xf32>
    %54 = arith.mulf %53, %40 : vector<8x128xf32>
    %55 = arith.subf %52, %54 : vector<8x128xf32>
    %56 = vector.broadcast %4 : f32 to vector<8x128xf32>
    %57 = arith.mulf %56, %40 : vector<8x128xf32>
    %58 = vector.broadcast %20 : f32 to vector<8x128xf32>
    %59 = arith.mulf %58, %37 : vector<8x128xf32>
    %60 = arith.addf %57, %59 : vector<8x128xf32>
    %61 = vector.broadcast %8 : f32 to vector<8x128xf32>
    %62 = arith.mulf %61, %37 : vector<8x128xf32>
    %63 = vector.broadcast %24 : f32 to vector<8x128xf32>
    %64 = arith.mulf %63, %40 : vector<8x128xf32>
    %65 = arith.subf %62, %64 : vector<8x128xf32>
    %66 = vector.broadcast %8 : f32 to vector<8x128xf32>
    %67 = arith.mulf %66, %40 : vector<8x128xf32>
    %68 = vector.broadcast %24 : f32 to vector<8x128xf32>
    %69 = arith.mulf %68, %37 : vector<8x128xf32>
    %70 = arith.addf %67, %69 : vector<8x128xf32>
    %71 = vector.broadcast %12 : f32 to vector<8x128xf32>
    %72 = arith.mulf %71, %37 : vector<8x128xf32>
    %73 = vector.broadcast %28 : f32 to vector<8x128xf32>
    %74 = arith.mulf %73, %40 : vector<8x128xf32>
    %75 = arith.subf %72, %74 : vector<8x128xf32>
    %76 = vector.broadcast %12 : f32 to vector<8x128xf32>
    %77 = arith.mulf %76, %40 : vector<8x128xf32>
    %78 = vector.broadcast %28 : f32 to vector<8x128xf32>
    %79 = arith.mulf %78, %37 : vector<8x128xf32>
    %80 = arith.addf %77, %79 : vector<8x128xf32>
    %c1_5 = arith.constant 1 : index
    %81 = arith.index_cast %34 : i32 to index
    %c0_6 = arith.constant 0 : index
    %82 = vector.load %arg2[%c1_5, %81, %c0_6] : memref<8x16x128xf32, #tpu.memory_space<vmem>>, vector<1x8x128xf32>
    %83 = vector.shape_cast %82 : vector<1x8x128xf32> to vector<8x128xf32>
    %c5_7 = arith.constant 5 : index
    %84 = arith.index_cast %34 : i32 to index
    %c0_8 = arith.constant 0 : index
    %85 = vector.load %arg2[%c5_7, %84, %c0_8] : memref<8x16x128xf32, #tpu.memory_space<vmem>>, vector<1x8x128xf32>
    %86 = vector.shape_cast %85 : vector<1x8x128xf32> to vector<8x128xf32>
    %87 = vector.broadcast %1 : f32 to vector<8x128xf32>
    %88 = arith.mulf %87, %83 : vector<8x128xf32>
    %89 = vector.broadcast %17 : f32 to vector<8x128xf32>
    %90 = arith.mulf %89, %86 : vector<8x128xf32>
    %91 = arith.subf %88, %90 : vector<8x128xf32>
    %92 = vector.broadcast %1 : f32 to vector<8x128xf32>
    %93 = arith.mulf %92, %86 : vector<8x128xf32>
    %94 = vector.broadcast %17 : f32 to vector<8x128xf32>
    %95 = arith.mulf %94, %83 : vector<8x128xf32>
    %96 = arith.addf %93, %95 : vector<8x128xf32>
    %97 = arith.addf %45, %91 : vector<8x128xf32>
    %98 = arith.addf %50, %96 : vector<8x128xf32>
    %99 = vector.broadcast %5 : f32 to vector<8x128xf32>
    %100 = arith.mulf %99, %83 : vector<8x128xf32>
    %101 = vector.broadcast %21 : f32 to vector<8x128xf32>
    %102 = arith.mulf %101, %86 : vector<8x128xf32>
    %103 = arith.subf %100, %102 : vector<8x128xf32>
    %104 = vector.broadcast %5 : f32 to vector<8x128xf32>
    %105 = arith.mulf %104, %86 : vector<8x128xf32>
    %106 = vector.broadcast %21 : f32 to vector<8x128xf32>
    %107 = arith.mulf %106, %83 : vector<8x128xf32>
    %108 = arith.addf %105, %107 : vector<8x128xf32>
    %109 = arith.addf %55, %103 : vector<8x128xf32>
    %110 = arith.addf %60, %108 : vector<8x128xf32>
    %111 = vector.broadcast %9 : f32 to vector<8x128xf32>
    %112 = arith.mulf %111, %83 : vector<8x128xf32>
    %113 = vector.broadcast %25 : f32 to vector<8x128xf32>
    %114 = arith.mulf %113, %86 : vector<8x128xf32>
    %115 = arith.subf %112, %114 : vector<8x128xf32>
    %116 = vector.broadcast %9 : f32 to vector<8x128xf32>
    %117 = arith.mulf %116, %86 : vector<8x128xf32>
    %118 = vector.broadcast %25 : f32 to vector<8x128xf32>
    %119 = arith.mulf %118, %83 : vector<8x128xf32>
    %120 = arith.addf %117, %119 : vector<8x128xf32>
    %121 = arith.addf %65, %115 : vector<8x128xf32>
    %122 = arith.addf %70, %120 : vector<8x128xf32>
    %123 = vector.broadcast %13 : f32 to vector<8x128xf32>
    %124 = arith.mulf %123, %83 : vector<8x128xf32>
    %125 = vector.broadcast %29 : f32 to vector<8x128xf32>
    %126 = arith.mulf %125, %86 : vector<8x128xf32>
    %127 = arith.subf %124, %126 : vector<8x128xf32>
    %128 = vector.broadcast %13 : f32 to vector<8x128xf32>
    %129 = arith.mulf %128, %86 : vector<8x128xf32>
    %130 = vector.broadcast %29 : f32 to vector<8x128xf32>
    %131 = arith.mulf %130, %83 : vector<8x128xf32>
    %132 = arith.addf %129, %131 : vector<8x128xf32>
    %133 = arith.addf %75, %127 : vector<8x128xf32>
    %134 = arith.addf %80, %132 : vector<8x128xf32>
    %c2_9 = arith.constant 2 : index
    %135 = arith.index_cast %34 : i32 to index
    %c0_10 = arith.constant 0 : index
    %136 = vector.load %arg2[%c2_9, %135, %c0_10] : memref<8x16x128xf32, #tpu.memory_space<vmem>>, vector<1x8x128xf32>
    %137 = vector.shape_cast %136 : vector<1x8x128xf32> to vector<8x128xf32>
    %c6_11 = arith.constant 6 : index
    %138 = arith.index_cast %34 : i32 to index
    %c0_12 = arith.constant 0 : index
    %139 = vector.load %arg2[%c6_11, %138, %c0_12] : memref<8x16x128xf32, #tpu.memory_space<vmem>>, vector<1x8x128xf32>
    %140 = vector.shape_cast %139 : vector<1x8x128xf32> to vector<8x128xf32>
    %141 = vector.broadcast %2 : f32 to vector<8x128xf32>
    %142 = arith.mulf %141, %137 : vector<8x128xf32>
    %143 = vector.broadcast %18 : f32 to vector<8x128xf32>
    %144 = arith.mulf %143, %140 : vector<8x128xf32>
    %145 = arith.subf %142, %144 : vector<8x128xf32>
    %146 = vector.broadcast %2 : f32 to vector<8x128xf32>
    %147 = arith.mulf %146, %140 : vector<8x128xf32>
    %148 = vector.broadcast %18 : f32 to vector<8x128xf32>
    %149 = arith.mulf %148, %137 : vector<8x128xf32>
    %150 = arith.addf %147, %149 : vector<8x128xf32>
    %151 = arith.addf %97, %145 : vector<8x128xf32>
    %152 = arith.addf %98, %150 : vector<8x128xf32>
    %153 = vector.broadcast %6 : f32 to vector<8x128xf32>
    %154 = arith.mulf %153, %137 : vector<8x128xf32>
    %155 = vector.broadcast %22 : f32 to vector<8x128xf32>
    %156 = arith.mulf %155, %140 : vector<8x128xf32>
    %157 = arith.subf %154, %156 : vector<8x128xf32>
    %158 = vector.broadcast %6 : f32 to vector<8x128xf32>
    %159 = arith.mulf %158, %140 : vector<8x128xf32>
    %160 = vector.broadcast %22 : f32 to vector<8x128xf32>
    %161 = arith.mulf %160, %137 : vector<8x128xf32>
    %162 = arith.addf %159, %161 : vector<8x128xf32>
    %163 = arith.addf %109, %157 : vector<8x128xf32>
    %164 = arith.addf %110, %162 : vector<8x128xf32>
    %165 = vector.broadcast %10 : f32 to vector<8x128xf32>
    %166 = arith.mulf %165, %137 : vector<8x128xf32>
    %167 = vector.broadcast %26 : f32 to vector<8x128xf32>
    %168 = arith.mulf %167, %140 : vector<8x128xf32>
    %169 = arith.subf %166, %168 : vector<8x128xf32>
    %170 = vector.broadcast %10 : f32 to vector<8x128xf32>
    %171 = arith.mulf %170, %140 : vector<8x128xf32>
    %172 = vector.broadcast %26 : f32 to vector<8x128xf32>
    %173 = arith.mulf %172, %137 : vector<8x128xf32>
    %174 = arith.addf %171, %173 : vector<8x128xf32>
    %175 = arith.addf %121, %169 : vector<8x128xf32>
    %176 = arith.addf %122, %174 : vector<8x128xf32>
    %177 = vector.broadcast %14 : f32 to vector<8x128xf32>
    %178 = arith.mulf %177, %137 : vector<8x128xf32>
    %179 = vector.broadcast %30 : f32 to vector<8x128xf32>
    %180 = arith.mulf %179, %140 : vector<8x128xf32>
    %181 = arith.subf %178, %180 : vector<8x128xf32>
    %182 = vector.broadcast %14 : f32 to vector<8x128xf32>
    %183 = arith.mulf %182, %140 : vector<8x128xf32>
    %184 = vector.broadcast %30 : f32 to vector<8x128xf32>
    %185 = arith.mulf %184, %137 : vector<8x128xf32>
    %186 = arith.addf %183, %185 : vector<8x128xf32>
    %187 = arith.addf %133, %181 : vector<8x128xf32>
    %188 = arith.addf %134, %186 : vector<8x128xf32>
    %c3_13 = arith.constant 3 : index
    %189 = arith.index_cast %34 : i32 to index
    %c0_14 = arith.constant 0 : index
    %190 = vector.load %arg2[%c3_13, %189, %c0_14] : memref<8x16x128xf32, #tpu.memory_space<vmem>>, vector<1x8x128xf32>
    %191 = vector.shape_cast %190 : vector<1x8x128xf32> to vector<8x128xf32>
    %c7_15 = arith.constant 7 : index
    %192 = arith.index_cast %34 : i32 to index
    %c0_16 = arith.constant 0 : index
    %193 = vector.load %arg2[%c7_15, %192, %c0_16] : memref<8x16x128xf32, #tpu.memory_space<vmem>>, vector<1x8x128xf32>
    %194 = vector.shape_cast %193 : vector<1x8x128xf32> to vector<8x128xf32>
    %195 = vector.broadcast %3 : f32 to vector<8x128xf32>
    %196 = arith.mulf %195, %191 : vector<8x128xf32>
    %197 = vector.broadcast %19 : f32 to vector<8x128xf32>
    %198 = arith.mulf %197, %194 : vector<8x128xf32>
    %199 = arith.subf %196, %198 : vector<8x128xf32>
    %200 = vector.broadcast %3 : f32 to vector<8x128xf32>
    %201 = arith.mulf %200, %194 : vector<8x128xf32>
    %202 = vector.broadcast %19 : f32 to vector<8x128xf32>
    %203 = arith.mulf %202, %191 : vector<8x128xf32>
    %204 = arith.addf %201, %203 : vector<8x128xf32>
    %205 = arith.addf %151, %199 : vector<8x128xf32>
    %206 = arith.addf %152, %204 : vector<8x128xf32>
    %207 = vector.broadcast %7 : f32 to vector<8x128xf32>
    %208 = arith.mulf %207, %191 : vector<8x128xf32>
    %209 = vector.broadcast %23 : f32 to vector<8x128xf32>
    %210 = arith.mulf %209, %194 : vector<8x128xf32>
    %211 = arith.subf %208, %210 : vector<8x128xf32>
    %212 = vector.broadcast %7 : f32 to vector<8x128xf32>
    %213 = arith.mulf %212, %194 : vector<8x128xf32>
    %214 = vector.broadcast %23 : f32 to vector<8x128xf32>
    %215 = arith.mulf %214, %191 : vector<8x128xf32>
    %216 = arith.addf %213, %215 : vector<8x128xf32>
    %217 = arith.addf %163, %211 : vector<8x128xf32>
    %218 = arith.addf %164, %216 : vector<8x128xf32>
    %219 = vector.broadcast %11 : f32 to vector<8x128xf32>
    %220 = arith.mulf %219, %191 : vector<8x128xf32>
    %221 = vector.broadcast %27 : f32 to vector<8x128xf32>
    %222 = arith.mulf %221, %194 : vector<8x128xf32>
    %223 = arith.subf %220, %222 : vector<8x128xf32>
    %224 = vector.broadcast %11 : f32 to vector<8x128xf32>
    %225 = arith.mulf %224, %194 : vector<8x128xf32>
    %226 = vector.broadcast %27 : f32 to vector<8x128xf32>
    %227 = arith.mulf %226, %191 : vector<8x128xf32>
    %228 = arith.addf %225, %227 : vector<8x128xf32>
    %229 = arith.addf %175, %223 : vector<8x128xf32>
    %230 = arith.addf %176, %228 : vector<8x128xf32>
    %231 = vector.broadcast %15 : f32 to vector<8x128xf32>
    %232 = arith.mulf %231, %191 : vector<8x128xf32>
    %233 = vector.broadcast %31 : f32 to vector<8x128xf32>
    %234 = arith.mulf %233, %194 : vector<8x128xf32>
    %235 = arith.subf %232, %234 : vector<8x128xf32>
    %236 = vector.broadcast %15 : f32 to vector<8x128xf32>
    %237 = arith.mulf %236, %194 : vector<8x128xf32>
    %238 = vector.broadcast %31 : f32 to vector<8x128xf32>
    %239 = arith.mulf %238, %191 : vector<8x128xf32>
    %240 = arith.addf %237, %239 : vector<8x128xf32>
    %241 = arith.addf %187, %235 : vector<8x128xf32>
    %242 = arith.addf %188, %240 : vector<8x128xf32>
    %c0_17 = arith.constant 0 : index
    %243 = arith.index_cast %34 : i32 to index
    %c0_18 = arith.constant 0 : index
    %244 = vector.load %arg3[%c0_17, %243, %c0_18] : memref<8x16x128xf32, #tpu.memory_space<vmem>>, vector<1x8x128xf32>
    %245 = vector.shape_cast %244 : vector<1x8x128xf32> to vector<8x128xf32>
    %246 = vector.shape_cast %205 : vector<8x128xf32> to vector<1x8x128xf32>
    tpu.vector_store %arg3[%c0_17, %243, %c0_18], %246 {strides = array<i32>} : memref<8x16x128xf32, #tpu.memory_space<vmem>>, vector<1x8x128xf32>,
    %c1_19 = arith.constant 1 : index
    %247 = arith.index_cast %34 : i32 to index
    %c0_20 = arith.constant 0 : index
    %248 = vector.load %arg3[%c1_19, %247, %c0_20] : memref<8x16x128xf32, #tpu.memory_space<vmem>>, vector<1x8x128xf32>
    %249 = vector.shape_cast %248 : vector<1x8x128xf32> to vector<8x128xf32>
    %250 = vector.shape_cast %217 : vector<8x128xf32> to vector<1x8x128xf32>
    tpu.vector_store %arg3[%c1_19, %247, %c0_20], %250 {strides = array<i32>} : memref<8x16x128xf32, #tpu.memory_space<vmem>>, vector<1x8x128xf32>,
    %c2_21 = arith.constant 2 : index
    %251 = arith.index_cast %34 : i32 to index
    %c0_22 = arith.constant 0 : index
    %252 = vector.load %arg3[%c2_21, %251, %c0_22] : memref<8x16x128xf32, #tpu.memory_space<vmem>>, vector<1x8x128xf32>
    %253 = vector.shape_cast %252 : vector<1x8x128xf32> to vector<8x128xf32>
    %254 = vector.shape_cast %229 : vector<8x128xf32> to vector<1x8x128xf32>
    tpu.vector_store %arg3[%c2_21, %251, %c0_22], %254 {strides = array<i32>} : memref<8x16x128xf32, #tpu.memory_space<vmem>>, vector<1x8x128xf32>,
    %c3_23 = arith.constant 3 : index
    %255 = arith.index_cast %34 : i32 to index
    %c0_24 = arith.constant 0 : index
    %256 = vector.load %arg3[%c3_23, %255, %c0_24] : memref<8x16x128xf32, #tpu.memory_space<vmem>>, vector<1x8x128xf32>
    %257 = vector.shape_cast %256 : vector<1x8x128xf32> to vector<8x128xf32>
    %258 = vector.shape_cast %241 : vector<8x128xf32> to vector<1x8x128xf32>
    tpu.vector_store %arg3[%c3_23, %255, %c0_24], %258 {strides = array<i32>} : memref<8x16x128xf32, #tpu.memory_space<vmem>>, vector<1x8x128xf32>,
    %c4_25 = arith.constant 4 : index
    %259 = arith.index_cast %34 : i32 to index
    %c0_26 = arith.constant 0 : index
    %260 = vector.load %arg3[%c4_25, %259, %c0_26] : memref<8x16x128xf32, #tpu.memory_space<vmem>>, vector<1x8x128xf32>
    %261 = vector.shape_cast %260 : vector<1x8x128xf32> to vector<8x128xf32>
    %262 = vector.shape_cast %206 : vector<8x128xf32> to vector<1x8x128xf32>
    tpu.vector_store %arg3[%c4_25, %259, %c0_26], %262 {strides = array<i32>} : memref<8x16x128xf32, #tpu.memory_space<vmem>>, vector<1x8x128xf32>,
    %c5_27 = arith.constant 5 : index
    %263 = arith.index_cast %34 : i32 to index
    %c0_28 = arith.constant 0 : index
    %264 = vector.load %arg3[%c5_27, %263, %c0_28] : memref<8x16x128xf32, #tpu.memory_space<vmem>>, vector<1x8x128xf32>
    %265 = vector.shape_cast %264 : vector<1x8x128xf32> to vector<8x128xf32>
    %266 = vector.shape_cast %218 : vector<8x128xf32> to vector<1x8x128xf32>
    tpu.vector_store %arg3[%c5_27, %263, %c0_28], %266 {strides = array<i32>} : memref<8x16x128xf32, #tpu.memory_space<vmem>>, vector<1x8x128xf32>,
    %c6_29 = arith.constant 6 : index
    %267 = arith.index_cast %34 : i32 to index
    %c0_30 = arith.constant 0 : index
    %268 = vector.load %arg3[%c6_29, %267, %c0_30] : memref<8x16x128xf32, #tpu.memory_space<vmem>>, vector<1x8x128xf32>
    %269 = vector.shape_cast %268 : vector<1x8x128xf32> to vector<8x128xf32>
    %270 = vector.shape_cast %230 : vector<8x128xf32> to vector<1x8x128xf32>
    tpu.vector_store %arg3[%c6_29, %267, %c0_30], %270 {strides = array<i32>} : memref<8x16x128xf32, #tpu.memory_space<vmem>>, vector<1x8x128xf32>,
    %c7_31 = arith.constant 7 : index
    %271 = arith.index_cast %34 : i32 to index
    %c0_32 = arith.constant 0 : index
    %272 = vector.load %arg3[%c7_31, %271, %c0_32] : memref<8x16x128xf32, #tpu.memory_space<vmem>>, vector<1x8x128xf32>
    %273 = vector.shape_cast %272 : vector<1x8x128xf32> to vector<8x128xf32>
    %274 = vector.shape_cast %242 : vector<8x128xf32> to vector<1x8x128xf32>
    tpu.vector_store %arg3[%c7_31, %271, %c0_32], %274 {strides = array<i32>} : memref<8x16x128xf32, #tpu.memory_space<vmem>>, vector<1x8x128xf32>,
    %c16_i32_33 = arith.constant 16 : i32
    %275 = arith.muli %c0_i32, %c16_i32_33 : i32
    %c8_i32 = arith.constant 8 : i32
    %276 = arith.addi %275, %c8_i32 : i32
    %277 = tpu.assume_multiple %276, 8 : i32
    %c0_34 = arith.constant 0 : index
    %278 = arith.index_cast %277 : i32 to index
    %c0_35 = arith.constant 0 : index
    %279 = vector.load %arg2[%c0_34, %278, %c0_35] : memref<8x16x128xf32, #tpu.memory_space<vmem>>, vector<1x8x128xf32>
    %280 = vector.shape_cast %279 : vector<1x8x128xf32> to vector<8x128xf32>
    %c4_36 = arith.constant 4 : index
    %281 = arith.index_cast %277 : i32 to index
    %c0_37 = arith.constant 0 : index
    %282 = vector.load %arg2[%c4_36, %281, %c0_37] : memref<8x16x128xf32, #tpu.memory_space<vmem>>, vector<1x8x128xf32>
    %283 = vector.shape_cast %282 : vector<1x8x128xf32> to vector<8x128xf32>
    %284 = vector.broadcast %0 : f32 to vector<8x128xf32>
    %285 = arith.mulf %284, %280 : vector<8x128xf32>
    %286 = vector.broadcast %16 : f32 to vector<8x128xf32>
    %287 = arith.mulf %286, %283 : vector<8x128xf32>
    %288 = arith.subf %285, %287 : vector<8x128xf32>
    %289 = vector.broadcast %0 : f32 to vector<8x128xf32>
    %290 = arith.mulf %289, %283 : vector<8x128xf32>
    %291 = vector.broadcast %16 : f32 to vector<8x128xf32>
    %292 = arith.mulf %291, %280 : vector<8x128xf32>
    %293 = arith.addf %290, %292 : vector<8x128xf32>
    %294 = vector.broadcast %4 : f32 to vector<8x128xf32>
    %295 = arith.mulf %294, %280 : vector<8x128xf32>
    %296 = vector.broadcast %20 : f32 to vector<8x128xf32>
    %297 = arith.mulf %296, %283 : vector<8x128xf32>
    %298 = arith.subf %295, %297 : vector<8x128xf32>
    %299 = vector.broadcast %4 : f32 to vector<8x128xf32>
    %300 = arith.mulf %299, %283 : vector<8x128xf32>
    %301 = vector.broadcast %20 : f32 to vector<8x128xf32>
    %302 = arith.mulf %301, %280 : vector<8x128xf32>
    %303 = arith.addf %300, %302 : vector<8x128xf32>
    %304 = vector.broadcast %8 : f32 to vector<8x128xf32>
    %305 = arith.mulf %304, %280 : vector<8x128xf32>
    %306 = vector.broadcast %24 : f32 to vector<8x128xf32>
    %307 = arith.mulf %306, %283 : vector<8x128xf32>
    %308 = arith.subf %305, %307 : vector<8x128xf32>
    %309 = vector.broadcast %8 : f32 to vector<8x128xf32>
    %310 = arith.mulf %309, %283 : vector<8x128xf32>
    %311 = vector.broadcast %24 : f32 to vector<8x128xf32>
    %312 = arith.mulf %311, %280 : vector<8x128xf32>
    %313 = arith.addf %310, %312 : vector<8x128xf32>
    %314 = vector.broadcast %12 : f32 to vector<8x128xf32>
    %315 = arith.mulf %314, %280 : vector<8x128xf32>
    %316 = vector.broadcast %28 : f32 to vector<8x128xf32>
    %317 = arith.mulf %316, %283 : vector<8x128xf32>
    %318 = arith.subf %315, %317 : vector<8x128xf32>
    %319 = vector.broadcast %12 : f32 to vector<8x128xf32>
    %320 = arith.mulf %319, %283 : vector<8x128xf32>
    %321 = vector.broadcast %28 : f32 to vector<8x128xf32>
    %322 = arith.mulf %321, %280 : vector<8x128xf32>
    %323 = arith.addf %320, %322 : vector<8x128xf32>
    %c1_38 = arith.constant 1 : index
    %324 = arith.index_cast %277 : i32 to index
    %c0_39 = arith.constant 0 : index
    %325 = vector.load %arg2[%c1_38, %324, %c0_39] : memref<8x16x128xf32, #tpu.memory_space<vmem>>, vector<1x8x128xf32>
    %326 = vector.shape_cast %325 : vector<1x8x128xf32> to vector<8x128xf32>
    %c5_40 = arith.constant 5 : index
    %327 = arith.index_cast %277 : i32 to index
    %c0_41 = arith.constant 0 : index
    %328 = vector.load %arg2[%c5_40, %327, %c0_41] : memref<8x16x128xf32, #tpu.memory_space<vmem>>, vector<1x8x128xf32>
    %329 = vector.shape_cast %328 : vector<1x8x128xf32> to vector<8x128xf32>
    %330 = vector.broadcast %1 : f32 to vector<8x128xf32>
    %331 = arith.mulf %330, %326 : vector<8x128xf32>
    %332 = vector.broadcast %17 : f32 to vector<8x128xf32>
    %333 = arith.mulf %332, %329 : vector<8x128xf32>
    %334 = arith.subf %331, %333 : vector<8x128xf32>
    %335 = vector.broadcast %1 : f32 to vector<8x128xf32>
    %336 = arith.mulf %335, %329 : vector<8x128xf32>
    %337 = vector.broadcast %17 : f32 to vector<8x128xf32>
    %338 = arith.mulf %337, %326 : vector<8x128xf32>
    %339 = arith.addf %336, %338 : vector<8x128xf32>
    %340 = arith.addf %288, %334 : vector<8x128xf32>
    %341 = arith.addf %293, %339 : vector<8x128xf32>
    %342 = vector.broadcast %5 : f32 to vector<8x128xf32>
    %343 = arith.mulf %342, %326 : vector<8x128xf32>
    %344 = vector.broadcast %21 : f32 to vector<8x128xf32>
    %345 = arith.mulf %344, %329 : vector<8x128xf32>
    %346 = arith.subf %343, %345 : vector<8x128xf32>
    %347 = vector.broadcast %5 : f32 to vector<8x128xf32>
    %348 = arith.mulf %347, %329 : vector<8x128xf32>
    %349 = vector.broadcast %21 : f32 to vector<8x128xf32>
    %350 = arith.mulf %349, %326 : vector<8x128xf32>
    %351 = arith.addf %348, %350 : vector<8x128xf32>
    %352 = arith.addf %298, %346 : vector<8x128xf32>
    %353 = arith.addf %303, %351 : vector<8x128xf32>
    %354 = vector.broadcast %9 : f32 to vector<8x128xf32>
    %355 = arith.mulf %354, %326 : vector<8x128xf32>
    %356 = vector.broadcast %25 : f32 to vector<8x128xf32>
    %357 = arith.mulf %356, %329 : vector<8x128xf32>
    %358 = arith.subf %355, %357 : vector<8x128xf32>
    %359 = vector.broadcast %9 : f32 to vector<8x128xf32>
    %360 = arith.mulf %359, %329 : vector<8x128xf32>
    %361 = vector.broadcast %25 : f32 to vector<8x128xf32>
    %362 = arith.mulf %361, %326 : vector<8x128xf32>
    %363 = arith.addf %360, %362 : vector<8x128xf32>
    %364 = arith.addf %308, %358 : vector<8x128xf32>
    %365 = arith.addf %313, %363 : vector<8x128xf32>
    %366 = vector.broadcast %13 : f32 to vector<8x128xf32>
    %367 = arith.mulf %366, %326 : vector<8x128xf32>
    %368 = vector.broadcast %29 : f32 to vector<8x128xf32>
    %369 = arith.mulf %368, %329 : vector<8x128xf32>
    %370 = arith.subf %367, %369 : vector<8x128xf32>
    %371 = vector.broadcast %13 : f32 to vector<8x128xf32>
    %372 = arith.mulf %371, %329 : vector<8x128xf32>
    %373 = vector.broadcast %29 : f32 to vector<8x128xf32>
    %374 = arith.mulf %373, %326 : vector<8x128xf32>
    %375 = arith.addf %372, %374 : vector<8x128xf32>
    %376 = arith.addf %318, %370 : vector<8x128xf32>
    %377 = arith.addf %323, %375 : vector<8x128xf32>
    %c2_42 = arith.constant 2 : index
    %378 = arith.index_cast %277 : i32 to index
    %c0_43 = arith.constant 0 : index
    %379 = vector.load %arg2[%c2_42, %378, %c0_43] : memref<8x16x128xf32, #tpu.memory_space<vmem>>, vector<1x8x128xf32>
    %380 = vector.shape_cast %379 : vector<1x8x128xf32> to vector<8x128xf32>
    %c6_44 = arith.constant 6 : index
    %381 = arith.index_cast %277 : i32 to index
    %c0_45 = arith.constant 0 : index
    %382 = vector.load %arg2[%c6_44, %381, %c0_45] : memref<8x16x128xf32, #tpu.memory_space<vmem>>, vector<1x8x128xf32>
    %383 = vector.shape_cast %382 : vector<1x8x128xf32> to vector<8x128xf32>
    %384 = vector.broadcast %2 : f32 to vector<8x128xf32>
    %385 = arith.mulf %384, %380 : vector<8x128xf32>
    %386 = vector.broadcast %18 : f32 to vector<8x128xf32>
    %387 = arith.mulf %386, %383 : vector<8x128xf32>
    %388 = arith.subf %385, %387 : vector<8x128xf32>
    %389 = vector.broadcast %2 : f32 to vector<8x128xf32>
    %390 = arith.mulf %389, %383 : vector<8x128xf32>
    %391 = vector.broadcast %18 : f32 to vector<8x128xf32>
    %392 = arith.mulf %391, %380 : vector<8x128xf32>
    %393 = arith.addf %390, %392 : vector<8x128xf32>
    %394 = arith.addf %340, %388 : vector<8x128xf32>
    %395 = arith.addf %341, %393 : vector<8x128xf32>
    %396 = vector.broadcast %6 : f32 to vector<8x128xf32>
    %397 = arith.mulf %396, %380 : vector<8x128xf32>
    %398 = vector.broadcast %22 : f32 to vector<8x128xf32>
    %399 = arith.mulf %398, %383 : vector<8x128xf32>
    %400 = arith.subf %397, %399 : vector<8x128xf32>
    %401 = vector.broadcast %6 : f32 to vector<8x128xf32>
    %402 = arith.mulf %401, %383 : vector<8x128xf32>
    %403 = vector.broadcast %22 : f32 to vector<8x128xf32>
    %404 = arith.mulf %403, %380 : vector<8x128xf32>
    %405 = arith.addf %402, %404 : vector<8x128xf32>
    %406 = arith.addf %352, %400 : vector<8x128xf32>
    %407 = arith.addf %353, %405 : vector<8x128xf32>
    %408 = vector.broadcast %10 : f32 to vector<8x128xf32>
    %409 = arith.mulf %408, %380 : vector<8x128xf32>
    %410 = vector.broadcast %26 : f32 to vector<8x128xf32>
    %411 = arith.mulf %410, %383 : vector<8x128xf32>
    %412 = arith.subf %409, %411 : vector<8x128xf32>
    %413 = vector.broadcast %10 : f32 to vector<8x128xf32>
    %414 = arith.mulf %413, %383 : vector<8x128xf32>
    %415 = vector.broadcast %26 : f32 to vector<8x128xf32>
    %416 = arith.mulf %415, %380 : vector<8x128xf32>
    %417 = arith.addf %414, %416 : vector<8x128xf32>
    %418 = arith.addf %364, %412 : vector<8x128xf32>
    %419 = arith.addf %365, %417 : vector<8x128xf32>
    %420 = vector.broadcast %14 : f32 to vector<8x128xf32>
    %421 = arith.mulf %420, %380 : vector<8x128xf32>
    %422 = vector.broadcast %30 : f32 to vector<8x128xf32>
    %423 = arith.mulf %422, %383 : vector<8x128xf32>
    %424 = arith.subf %421, %423 : vector<8x128xf32>
    %425 = vector.broadcast %14 : f32 to vector<8x128xf32>
    %426 = arith.mulf %425, %383 : vector<8x128xf32>
    %427 = vector.broadcast %30 : f32 to vector<8x128xf32>
    %428 = arith.mulf %427, %380 : vector<8x128xf32>
    %429 = arith.addf %426, %428 : vector<8x128xf32>
    %430 = arith.addf %376, %424 : vector<8x128xf32>
    %431 = arith.addf %377, %429 : vector<8x128xf32>
    %c3_46 = arith.constant 3 : index
    %432 = arith.index_cast %277 : i32 to index
    %c0_47 = arith.constant 0 : index
    %433 = vector.load %arg2[%c3_46, %432, %c0_47] : memref<8x16x128xf32, #tpu.memory_space<vmem>>, vector<1x8x128xf32>
    %434 = vector.shape_cast %433 : vector<1x8x128xf32> to vector<8x128xf32>
    %c7_48 = arith.constant 7 : index
    %435 = arith.index_cast %277 : i32 to index
    %c0_49 = arith.constant 0 : index
    %436 = vector.load %arg2[%c7_48, %435, %c0_49] : memref<8x16x128xf32, #tpu.memory_space<vmem>>, vector<1x8x128xf32>
    %437 = vector.shape_cast %436 : vector<1x8x128xf32> to vector<8x128xf32>
    %438 = vector.broadcast %3 : f32 to vector<8x128xf32>
    %439 = arith.mulf %438, %434 : vector<8x128xf32>
    %440 = vector.broadcast %19 : f32 to vector<8x128xf32>
    %441 = arith.mulf %440, %437 : vector<8x128xf32>
    %442 = arith.subf %439, %441 : vector<8x128xf32>
    %443 = vector.broadcast %3 : f32 to vector<8x128xf32>
    %444 = arith.mulf %443, %437 : vector<8x128xf32>
    %445 = vector.broadcast %19 : f32 to vector<8x128xf32>
    %446 = arith.mulf %445, %434 : vector<8x128xf32>
    %447 = arith.addf %444, %446 : vector<8x128xf32>
    %448 = arith.addf %394, %442 : vector<8x128xf32>
    %449 = arith.addf %395, %447 : vector<8x128xf32>
    %450 = vector.broadcast %7 : f32 to vector<8x128xf32>
    %451 = arith.mulf %450, %434 : vector<8x128xf32>
    %452 = vector.broadcast %23 : f32 to vector<8x128xf32>
    %453 = arith.mulf %452, %437 : vector<8x128xf32>
    %454 = arith.subf %451, %453 : vector<8x128xf32>
    %455 = vector.broadcast %7 : f32 to vector<8x128xf32>
    %456 = arith.mulf %455, %437 : vector<8x128xf32>
    %457 = vector.broadcast %23 : f32 to vector<8x128xf32>
    %458 = arith.mulf %457, %434 : vector<8x128xf32>
    %459 = arith.addf %456, %458 : vector<8x128xf32>
    %460 = arith.addf %406, %454 : vector<8x128xf32>
    %461 = arith.addf %407, %459 : vector<8x128xf32>
    %462 = vector.broadcast %11 : f32 to vector<8x128xf32>
    %463 = arith.mulf %462, %434 : vector<8x128xf32>
    %464 = vector.broadcast %27 : f32 to vector<8x128xf32>
    %465 = arith.mulf %464, %437 : vector<8x128xf32>
    %466 = arith.subf %463, %465 : vector<8x128xf32>
    %467 = vector.broadcast %11 : f32 to vector<8x128xf32>
    %468 = arith.mulf %467, %437 : vector<8x128xf32>
    %469 = vector.broadcast %27 : f32 to vector<8x128xf32>
    %470 = arith.mulf %469, %434 : vector<8x128xf32>
    %471 = arith.addf %468, %470 : vector<8x128xf32>
    %472 = arith.addf %418, %466 : vector<8x128xf32>
    %473 = arith.addf %419, %471 : vector<8x128xf32>
    %474 = vector.broadcast %15 : f32 to vector<8x128xf32>
    %475 = arith.mulf %474, %434 : vector<8x128xf32>
    %476 = vector.broadcast %31 : f32 to vector<8x128xf32>
    %477 = arith.mulf %476, %437 : vector<8x128xf32>
    %478 = arith.subf %475, %477 : vector<8x128xf32>
    %479 = vector.broadcast %15 : f32 to vector<8x128xf32>
    %480 = arith.mulf %479, %437 : vector<8x128xf32>
    %481 = vector.broadcast %31 : f32 to vector<8x128xf32>
    %482 = arith.mulf %481, %434 : vector<8x128xf32>
    %483 = arith.addf %480, %482 : vector<8x128xf32>
    %484 = arith.addf %430, %478 : vector<8x128xf32>
    %485 = arith.addf %431, %483 : vector<8x128xf32>
    %c0_50 = arith.constant 0 : index
    %486 = arith.index_cast %277 : i32 to index
    %c0_51 = arith.constant 0 : index
    %487 = vector.load %arg3[%c0_50, %486, %c0_51] : memref<8x16x128xf32, #tpu.memory_space<vmem>>, vector<1x8x128xf32>
    %488 = vector.shape_cast %487 : vector<1x8x128xf32> to vector<8x128xf32>
    %489 = vector.shape_cast %448 : vector<8x128xf32> to vector<1x8x128xf32>
    tpu.vector_store %arg3[%c0_50, %486, %c0_51], %489 {strides = array<i32>} : memref<8x16x128xf32, #tpu.memory_space<vmem>>, vector<1x8x128xf32>,
    %c1_52 = arith.constant 1 : index
    %490 = arith.index_cast %277 : i32 to index
    %c0_53 = arith.constant 0 : index
    %491 = vector.load %arg3[%c1_52, %490, %c0_53] : memref<8x16x128xf32, #tpu.memory_space<vmem>>, vector<1x8x128xf32>
    %492 = vector.shape_cast %491 : vector<1x8x128xf32> to vector<8x128xf32>
    %493 = vector.shape_cast %460 : vector<8x128xf32> to vector<1x8x128xf32>
    tpu.vector_store %arg3[%c1_52, %490, %c0_53], %493 {strides = array<i32>} : memref<8x16x128xf32, #tpu.memory_space<vmem>>, vector<1x8x128xf32>,
    %c2_54 = arith.constant 2 : index
    %494 = arith.index_cast %277 : i32 to index
    %c0_55 = arith.constant 0 : index
    %495 = vector.load %arg3[%c2_54, %494, %c0_55] : memref<8x16x128xf32, #tpu.memory_space<vmem>>, vector<1x8x128xf32>
    %496 = vector.shape_cast %495 : vector<1x8x128xf32> to vector<8x128xf32>
    %497 = vector.shape_cast %472 : vector<8x128xf32> to vector<1x8x128xf32>
    tpu.vector_store %arg3[%c2_54, %494, %c0_55], %497 {strides = array<i32>} : memref<8x16x128xf32, #tpu.memory_space<vmem>>, vector<1x8x128xf32>,
    %c3_56 = arith.constant 3 : index
    %498 = arith.index_cast %277 : i32 to index
    %c0_57 = arith.constant 0 : index
    %499 = vector.load %arg3[%c3_56, %498, %c0_57] : memref<8x16x128xf32, #tpu.memory_space<vmem>>, vector<1x8x128xf32>
    %500 = vector.shape_cast %499 : vector<1x8x128xf32> to vector<8x128xf32>
    %501 = vector.shape_cast %484 : vector<8x128xf32> to vector<1x8x128xf32>
    tpu.vector_store %arg3[%c3_56, %498, %c0_57], %501 {strides = array<i32>} : memref<8x16x128xf32, #tpu.memory_space<vmem>>, vector<1x8x128xf32>,
    %c4_58 = arith.constant 4 : index
    %502 = arith.index_cast %277 : i32 to index
    %c0_59 = arith.constant 0 : index
    %503 = vector.load %arg3[%c4_58, %502, %c0_59] : memref<8x16x128xf32, #tpu.memory_space<vmem>>, vector<1x8x128xf32>
    %504 = vector.shape_cast %503 : vector<1x8x128xf32> to vector<8x128xf32>
    %505 = vector.shape_cast %449 : vector<8x128xf32> to vector<1x8x128xf32>
    tpu.vector_store %arg3[%c4_58, %502, %c0_59], %505 {strides = array<i32>} : memref<8x16x128xf32, #tpu.memory_space<vmem>>, vector<1x8x128xf32>,
    %c5_60 = arith.constant 5 : index
    %506 = arith.index_cast %277 : i32 to index
    %c0_61 = arith.constant 0 : index
    %507 = vector.load %arg3[%c5_60, %506, %c0_61] : memref<8x16x128xf32, #tpu.memory_space<vmem>>, vector<1x8x128xf32>
    %508 = vector.shape_cast %507 : vector<1x8x128xf32> to vector<8x128xf32>
    %509 = vector.shape_cast %461 : vector<8x128xf32> to vector<1x8x128xf32>
    tpu.vector_store %arg3[%c5_60, %506, %c0_61], %509 {strides = array<i32>} : memref<8x16x128xf32, #tpu.memory_space<vmem>>, vector<1x8x128xf32>,
    %c6_62 = arith.constant 6 : index
    %510 = arith.index_cast %277 : i32 to index
    %c0_63 = arith.constant 0 : index
    %511 = vector.load %arg3[%c6_62, %510, %c0_63] : memref<8x16x128xf32, #tpu.memory_space<vmem>>, vector<1x8x128xf32>
    %512 = vector.shape_cast %511 : vector<1x8x128xf32> to vector<8x128xf32>
    %513 = vector.shape_cast %473 : vector<8x128xf32> to vector<1x8x128xf32>
    tpu.vector_store %arg3[%c6_62, %510, %c0_63], %513 {strides = array<i32>} : memref<8x16x128xf32, #tpu.memory_space<vmem>>, vector<1x8x128xf32>,
    %c7_64 = arith.constant 7 : index
    %514 = arith.index_cast %277 : i32 to index
    %c0_65 = arith.constant 0 : index
    %515 = vector.load %arg3[%c7_64, %514, %c0_65] : memref<8x16x128xf32, #tpu.memory_space<vmem>>, vector<1x8x128xf32>
    %516 = vector.shape_cast %515 : vector<1x8x128xf32> to vector<8x128xf32>
    %517 = vector.shape_cast %485 : vector<8x128xf32> to vector<1x8x128xf32>
    tpu.vector_store %arg3[%c7_64, %514, %c0_65], %517 {strides = array<i32>} : memref<8x16x128xf32, #tpu.memory_space<vmem>>, vector<1x8x128xf32>,
    %c1_i32 = arith.constant 1 : i32
    return
  }
  func.func @transform_0(%arg0: i32) -> i32 {
    %c0_i32 = arith.constant 0 : i32
    %c0_i32_0 = arith.constant 0 : i32
    return %c0_i32 : i32
  }
  func.func @transform_1(%arg0: i32) -> (i32, i32, i32) {
    %c0_i32 = arith.constant 0 : i32
    %c0_i32_0 = arith.constant 0 : i32
    %c0_i32_1 = arith.constant 0 : i32
    return %c0_i32, %arg0, %c0_i32_0 : i32, i32, i32
  }
  func.func @transform_2(%arg0: i32) -> (i32, i32, i32) {
    %c0_i32 = arith.constant 0 : i32
    %c0_i32_0 = arith.constant 0 : i32
    %c0_i32_1 = arith.constant 0 : i32
    return %c0_i32, %arg0, %c0_i32_0 : i32, i32, i32
  }
}

</mosaic_0001>

<bundles_post_ra>
// kernel: tpu_custom_call.1
= control target key start
LH: loop header
LB: loop body
LE: loop exit
PB: predicated region body
PF: predicated region fallthrough
CT: control target
= control target key end

     0   :  { %7 = vsyncpa [#allocation5], 0  ;;  %s1051_s0 = inlined_call_operand.hbm [shape: f32[32], index: 0, kind: input, shape index: {}]   ;;  %s1052_s1 = inlined_call_operand.hbm [shape: f32[8,16,128], index: 1, kind: input, shape index: {}]   ;;  %s1053_s2 = inlined_call_operand.hbm [shape: f32[8,16,128], index: 2, kind: output, shape index: {}]  }
   0x1   :  { %8 = vsyncpa [#allocation3], 0 }
   0x2   :  { %9 = vsyncpa [#allocation4], 0  ;;  %s499_s11 = scalar_lea.hbm %s1051_s0, 16 }
   0x3   :  { %p500_p0 = scmp.ne.s32.totalorder %s1051_s0, %s499_s11  ;;  %p503_p1 = scmp.lt.u32.totalorder %s499_s11, %s1051_s0 }
   0x5   :  { %p505_p2 = pnand %p503_p1, %p500_p0 }
   0x7   :  { %508 = shalt.err (!%p505_p2)
}
   0x8   :  { %s559_s16 = smov [#allocation2]   ;;  %s560_s19 = smov [#allocation6]  }
   0x9   :  { %17 = dma.hbm_to_smem %s1051_s0, 16, %s559_s16, [#allocation5]  }
   0xa   :  { %s23_s20 = sshll.u32 %s560_s19, 4  ;;  %s509_s23 = scalar_lea.hbm %s1052_s1, 2048  ;;  %s24_s20 = int_to_ptr.vmem [resolvable:$true] %s23_s20 }
   0xb   :  { %p510_p3 = scmp.ne.s32.totalorder %s1052_s1, %s509_s23  ;;  %p513_p4 = scmp.lt.u32.totalorder %s509_s23, %s1052_s1 }
   0xd   :  { %p515_p5 = pnand %p513_p4, %p510_p3 }
   0xf   :  { %518 = shalt.err (!%p515_p5)
}
  0x10   :  { %s519_s28 = scalar_lea.vmem %s24_s20, 2048  ;;  %p524_p7 = scmp.lt.s32.totalorder %s24_s20, %s24_s20 }
  0x11   :  { %p520_p6 = scmp.ne.s32.totalorder %s24_s20, %s519_s28  ;;  %p525_p8 = scmp.lt.s32.totalorder %s519_s28, %s519_s28 }
  0x13   :  { %p526_p9 = por %p525_p8, %p524_p7 }
  0x15   :  { %p527_p10 = pnand %p526_p9, %p520_p6 }
  0x17   :  { %530 = shalt.err (!%p527_p10)
}
  0x18   :  { %s561_s0 = smov 128   ;;  %s562_s29 = smov 8  }
  0x19   :  { %29 = dma.hbm_to_vmem [thread:$0]  %s1052_s1, 2048, %s24_s20, [#allocation3], %s561_s0, %s561_s0, %s562_s29  }
  0x1a   :  { %553 = dma.done.wait [#allocation5], 16  }
  0x1b   :  { %554 = vsyncadd [#allocation5], 4294967280 }
  0x1c   :  { %555 = dma.done.wait [#allocation3], 2048  }
  0x1d   :  { %556 = vsyncadd [#allocation3], 4294965248 }
  0x1e   :  { %36 = sfence }
  0x1f   :  { %s37_s4 = sld [smem:[#allocation2]]  ;;  %s463_s5 = sld [smem:[#allocation2 + $0x1]]  ;;  %v610_v0 = vld [vmem:[#allocation6] sm:$0xff]  ;;  %v612_v1 = vld [vmem:[#allocation6 + $0x10] sm:$0xff] }
  0x20   :  { %s464_s6 = sld [smem:[#allocation2 + $0x2]]  ;;  %s465_s7 = sld [smem:[#allocation2 + $0x3]]  ;;  %v618_v2 = vld [vmem:[#allocation6 + $0x20] sm:$0xff]  ;;  %v620_v3 = vld [vmem:[#allocation6 + $0x30] sm:$0xff] }
  0x21   :  { %s478_s8 = sld [smem:[#allocation2 + $0x10]]  ;;  %s479_s9 = sld [smem:[#allocation2 + $0x11]]  ;;  %v626_v4 = vld [vmem:[#allocation6 + $0x40] sm:$0xff]  ;;  %v630_v6 = vld [vmem:[#allocation6 + $0x50] sm:$0xff] }
  0x22   :  { %s606_s10 = sld [smem:[#allocation2 + $0x12]]  ;;  %s608_s11 = sld [smem:[#allocation2 + $0x13]]  ;;  %v642_v10 = vld [vmem:[#allocation6 + $0x60] sm:$0xff]  ;;  %v646_v12 = vld [vmem:[#allocation6 + $0x70] sm:$0xff] }
  0x23   :  { %s614_s1 = sld [smem:[#allocation2 + $0x4]]  ;;  %s616_s12 = sld [smem:[#allocation2 + $0x5]] }
  0x24   :  { %s622_s13 = sld [smem:[#allocation2 + $0x6]]  ;;  %s624_s14 = sld [smem:[#allocation2 + $0x7]] }
  0x25   :  { %v628_v5 = vstv %s37_s4  ;;  %v632_v7 = vstv %s463_s5  ;;  %s634_s15 = sld [smem:[#allocation2 + $0x14]]  ;;  %s636_s16 = sld [smem:[#allocation2 + $0x15]] }
  0x26   :  { %v74_v8 = vmul.f32 %v628_v5, %v610_v0  ;;  %v112_v9 = vmul.f32 %v632_v7, %v612_v1  ;;  %v644_v11 = vstv %s464_s6  ;;  %v648_v13 = vstv %s465_s7  ;;  %s650_s17 = sld [smem:[#allocation2 + $0x16]]  ;;  %s652_s18 = sld [smem:[#allocation2 + $0x17]] }
  0x27   :  { %v654_v14 = vstv %s478_s8  ;;  %v656_v15 = vstv %s479_s9  ;;  %v158_v16 = vmul.f32 %v644_v11, %v618_v2  ;;  %v204_v17 = vmul.f32 %v648_v13, %v620_v3  ;;  %s662_s19 = sld [smem:[#allocation2 + $0x8]]  ;;  %s674_s20 = sld [smem:[#allocation2 + $0x9]] }
  0x28   :  { %v76_v18 = vmul.f32 %v654_v14, %v626_v4  ;;  %v114_v19 = vmul.f32 %v656_v15, %v630_v6  ;;  %v669_v20 = vstv %s606_s10  ;;  %v672_v21 = vstv %s608_s11  ;;  %s686_s21 = sld [smem:[#allocation2 + $0x18]]  ;;  %s688_s22 = sld [smem:[#allocation2 + $0x19]] }
  0x29   :  { %v160_v22 = vmul.f32 %v669_v20, %v642_v10  ;;  %v206_v23 = vmul.f32 %v672_v21, %v646_v12  ;;  %v681_v24 = vstv %s614_s1  ;;  %v684_v25 = vstv %s616_s12  ;;  %s694_s23 = sld [smem:[#allocation2 + $0xa]]  ;;  %s702_s24 = sld [smem:[#allocation2 + $0xb]] }
  0x2a   :  { %v77_v26 = vsub.f32 %v74_v8, %v76_v18  ;;  %v115_v27 = vsub.f32 %v112_v9, %v114_v19  ;;  %v82_v28 = vmul.f32 %v681_v24, %v610_v0  ;;  %v122_v29 = vmul.f32 %v684_v25, %v612_v1  ;;  %s704_s25 = sld [smem:[#allocation2 + $0x1a]]  ;;  %s713_s26 = sld [smem:[#allocation2 + $0x1b]] }
  0x2b   :  { %v161_v30 = vsub.f32 %v158_v16, %v160_v22  ;;  %v207_v31 = vsub.f32 %v204_v17, %v206_v23  ;;  %v697_v32 = vstv %s634_s15  ;;  %v700_v33 = vstv %s636_s16  ;;  %s715_s27 = sld [smem:[#allocation2 + $0xc]]  ;;  %s728_s28 = sld [smem:[#allocation2 + $0xd]] }
  0x2c   :  { %v119_v34 = vadd.f32 %v115_v27, %v77_v26  ;;  %v84_v35 = vmul.f32 %v697_v32, %v626_v4  ;;  %v124_v36 = vmul.f32 %v700_v33, %v630_v6  ;;  %v711_v37 = vstv %s622_s13  ;;  %s730_s30 = sld [smem:[#allocation2 + $0x1c]]  ;;  %s744_s3 = sld [smem:[#allocation2 + $0xe]] }
  0x2d   :  { %v168_v38 = vmul.f32 %v711_v37, %v618_v2  ;;  %v720_v39 = vstv %s650_s17  ;;  %v723_v40 = vstv %s624_s14  ;;  %v726_v41 = vstv %s652_s18  ;;  %s746_s4 = sld [smem:[#allocation2 + $0x1d]]  ;;  %s750_s5 = sld [smem:[#allocation2 + $0xf]] }
  0x2e   :  { %v165_v42 = vadd.f32 %v161_v30, %v119_v34  ;;  %v85_v43 = vsub.f32 %v82_v28, %v84_v35  ;;  %v125_v44 = vsub.f32 %v122_v29, %v124_v36  ;;  %v170_v45 = vmul.f32 %v720_v39, %v642_v10  ;;  %s760_s6 = sld [smem:[#allocation2 + $0x1e]]  ;;  %s762_s7 = sld [smem:[#allocation2 + $0x1f]] }
  0x2f   :  { %v214_v46 = vmul.f32 %v723_v40, %v620_v3  ;;  %v216_v47 = vmul.f32 %v726_v41, %v646_v12  ;;  %v739_v48 = vstv %s662_s19  ;;  %v742_v49 = vstv %s686_s21  ;;  %s563_s8 = smov [#allocation7]  }
  0x30   :  { %v211_v50 = vadd.f32 %v207_v31, %v165_v42  ;;  %v129_v51 = vadd.f32 %v125_v44, %v85_v43  ;;  %v171_v52 = vsub.f32 %v168_v38, %v170_v45  ;;  %v90_v53 = vmul.f32 %v739_v48, %v610_v0  ;;  %s422_s9 = sshll.u32 %s563_s8, 4  ;;  %s423_s9 = int_to_ptr.vmem [resolvable:$true] %s422_s9 }
  0x31   :  { %v217_v54 = vsub.f32 %v214_v46, %v216_v47  ;;  %v92_v55 = vmul.f32 %v742_v49, %v626_v4  ;;  %v755_v56 = vstv %s674_s20  ;;  %v758_v57 = vstv %s688_s22  ;;  %s531_s10 = scalar_lea.vmem %s423_s9, 2048  ;;  %p536_p12 = scmp.lt.s32.totalorder %s423_s9, %s423_s9 }
  0x32   :  { %243 = vst [vmem:[#allocation7] sm:$0xff] %v211_v50  ;;  %v175_v58 = vadd.f32 %v171_v52, %v129_v51  ;;  %v132_v59 = vmul.f32 %v755_v56, %v612_v1  ;;  %v134_v60 = vmul.f32 %v758_v57, %v630_v6  ;;  %v769_v61 = vstv %s694_s23  ;;  %p532_p11 = scmp.ne.s32.totalorder %s423_s9, %s531_s10  ;;  %p537_p13 = scmp.lt.s32.totalorder %s531_s10, %s531_s10 }
  0x33   :  { %v93_v62 = vsub.f32 %v90_v53, %v92_v55  ;;  %v178_v63 = vmul.f32 %v769_v61, %v618_v2  ;;  %v774_v8 = vstv %s704_s25  ;;  %v777_v9 = vstv %s702_s24 }
  0x34   :  { %v221_v16 = vadd.f32 %v217_v54, %v175_v58  ;;  %v135_v17 = vsub.f32 %v132_v59, %v134_v60  ;;  %v180_v18 = vmul.f32 %v774_v8, %v642_v10  ;;  %v224_v19 = vmul.f32 %v777_v9, %v620_v3  ;;  %p538_p0 = por %p537_p13, %p536_p12 }
  0x35   :  { %v784_v22 = vstv %s713_s26  ;;  %v787_v23 = vstv %s715_s27  ;;  %v790_v26 = vstv %s730_s30  ;;  %v793_v27 = vstv %s728_s28 }
  0x36   :  { %245 = vst [vmem:[#allocation7 + $0x10] sm:$0xff] %v221_v16  ;;  %v139_v28 = vadd.f32 %v135_v17, %v93_v62  ;;  %v181_v29 = vsub.f32 %v178_v63, %v180_v18  ;;  %v226_v30 = vmul.f32 %v784_v22, %v646_v12  ;;  %v98_v31 = vmul.f32 %v787_v23, %v610_v0  ;;  %p539_p1 = pnand %p538_p0, %p532_p11 }
  0x37   :  { %v100_v34 = vmul.f32 %v790_v26, %v626_v4  ;;  %v142_v35 = vmul.f32 %v793_v27, %v612_v1  ;;  %v804_v36 = vstv %s746_s4  ;;  %v807_v38 = vstv %s744_s3 }
  0x38   :  { %v185_v42 = vadd.f32 %v181_v29, %v139_v28  ;;  %v227_v43 = vsub.f32 %v224_v19, %v226_v30  ;;  %v144_v44 = vmul.f32 %v804_v36, %v630_v6  ;;  %v188_v45 = vmul.f32 %v807_v38, %v618_v2 }
  0x39   :  { %v101_v46 = vsub.f32 %v98_v31, %v100_v34  ;;  %v814_v47 = vstv %s760_s6  ;;  %v817_v50 = vstv %s750_s5  ;;  %v820_v51 = vstv %s762_s7 }
  0x3a   :  { %v231_v52 = vadd.f32 %v227_v43, %v185_v42  ;;  %v145_v53 = vsub.f32 %v142_v35, %v144_v44  ;;  %v190_v54 = vmul.f32 %v814_v47, %v642_v10  ;;  %v234_v55 = vmul.f32 %v817_v50, %v620_v3 }
  0x3b   :  { %v236_v58 = vmul.f32 %v820_v51, %v646_v12  ;;  %v78_v59 = vmul.f32 %v628_v5, %v626_v4  ;;  %v79_v60 = vmul.f32 %v654_v14, %v610_v0  ;;  %v116_v62 = vmul.f32 %v632_v7, %v630_v6 }
  0x3c   :  { %247 = vst [vmem:[#allocation7 + $0x20] sm:$0xff] %v231_v52  ;;  %v149_v63 = vadd.f32 %v145_v53, %v101_v46  ;;  %v191_v16 = vsub.f32 %v188_v45, %v190_v54  ;;  %v117_v17 = vmul.f32 %v656_v15, %v612_v1  ;;  %v162_v18 = vmul.f32 %v644_v11, %v642_v10 }
  0x3d   :  { %v237_v19 = vsub.f32 %v234_v55, %v236_v58  ;;  %v80_v28 = vadd.f32 %v79_v60, %v78_v59  ;;  %v163_v29 = vmul.f32 %v669_v20, %v618_v2  ;;  %v208_v30 = vmul.f32 %v648_v13, %v646_v12 }
  0x3e   :  { %v195_v31 = vadd.f32 %v191_v16, %v149_v63  ;;  %v118_v34 = vadd.f32 %v117_v17, %v116_v62  ;;  %v209_v35 = vmul.f32 %v672_v21, %v620_v3  ;;  %v86_v42 = vmul.f32 %v681_v24, %v626_v4 }
  0x3f   :  { %v164_v43 = vadd.f32 %v163_v29, %v162_v18  ;;  %v87_v44 = vmul.f32 %v697_v32, %v610_v0  ;;  %v126_v45 = vmul.f32 %v684_v25, %v630_v6  ;;  %v127_v46 = vmul.f32 %v700_v33, %v612_v1 }
  0x40   :  { %v241_v52 = vadd.f32 %v237_v19, %v195_v31  ;;  %v120_v53 = vadd.f32 %v118_v34, %v80_v28  ;;  %v210_v54 = vadd.f32 %v209_v35, %v208_v30  ;;  %v172_v55 = vmul.f32 %v711_v37, %v642_v10 }
  0x41   :  { %v88_v58 = vadd.f32 %v87_v44, %v86_v42  ;;  %v128_v59 = vadd.f32 %v127_v46, %v126_v45  ;;  %v173_v60 = vmul.f32 %v720_v39, %v618_v2  ;;  %v218_v62 = vmul.f32 %v723_v40, %v646_v12 }
  0x42   :  { %249 = vst [vmem:[#allocation7 + $0x30] sm:$0xff] %v241_v52  ;;  %v166_v63 = vadd.f32 %v164_v43, %v120_v53  ;;  %v219_v16 = vmul.f32 %v726_v41, %v620_v3  ;;  %v94_v17 = vmul.f32 %v739_v48, %v626_v4  ;;  %v95_v18 = vmul.f32 %v742_v49, %v610_v0 }
  0x43   :  { %v130_v19 = vadd.f32 %v128_v59, %v88_v58  ;;  %v174_v28 = vadd.f32 %v173_v60, %v172_v55  ;;  %v136_v29 = vmul.f32 %v755_v56, %v630_v6  ;;  %v137_v30 = vmul.f32 %v758_v57, %v612_v1 }
  0x44   :  { %v212_v31 = vadd.f32 %v210_v54, %v166_v63  ;;  %v220_v34 = vadd.f32 %v219_v16, %v218_v62  ;;  %v96_v35 = vadd.f32 %v95_v18, %v94_v17  ;;  %v182_v42 = vmul.f32 %v769_v61, %v642_v10  ;;  %v884_v63 = vld [vmem:[#allocation6 + $0x8] sm:$0xff]  ;;  %v888_v17 = vld [vmem:[#allocation6 + $0x18] sm:$0xff] }
  0x45   :  { %v176_v43 = vadd.f32 %v174_v28, %v130_v19  ;;  %v138_v44 = vadd.f32 %v137_v30, %v136_v29  ;;  %v183_v45 = vmul.f32 %v774_v8, %v618_v2  ;;  %v228_v46 = vmul.f32 %v777_v9, %v646_v12  ;;  %v886_v16 = vld [vmem:[#allocation6 + $0x48] sm:$0xff]  ;;  %v894_v19 = vld [vmem:[#allocation6 + $0x58] sm:$0xff] }
  0x46   :  { %251 = vst [vmem:[#allocation7 + $0x40] sm:$0xff] %v212_v31  ;;  %v229_v52 = vmul.f32 %v784_v22, %v620_v3  ;;  %v102_v53 = vmul.f32 %v787_v23, %v626_v4  ;;  %v103_v54 = vmul.f32 %v790_v26, %v610_v0  ;;  %v146_v55 = vmul.f32 %v793_v27, %v630_v6  ;;  %v900_v31 = vld [vmem:[#allocation6 + $0x28] sm:$0xff] }
  0x47   :  { %v222_v58 = vadd.f32 %v220_v34, %v176_v43  ;;  %v140_v59 = vadd.f32 %v138_v44, %v96_v35  ;;  %v184_v60 = vadd.f32 %v183_v45, %v182_v42  ;;  %v147_v62 = vmul.f32 %v804_v36, %v612_v1  ;;  %v902_v34 = vld [vmem:[#allocation6 + $0x68] sm:$0xff]  ;;  %v904_v35 = vld [vmem:[#allocation6 + $0x38] sm:$0xff] }
  0x48   :  { %v230_v18 = vadd.f32 %v229_v52, %v228_v46  ;;  %v104_v4 = vadd.f32 %v103_v54, %v102_v53  ;;  %v192_v0 = vmul.f32 %v807_v38, %v642_v10  ;;  %v193_v6 = vmul.f32 %v814_v47, %v618_v2 }
  0x49   :  { %253 = vst [vmem:[#allocation7 + $0x50] sm:$0xff] %v222_v58  ;;  %v186_v28 = vadd.f32 %v184_v60, %v140_v59  ;;  %v148_v29 = vadd.f32 %v147_v62, %v146_v55  ;;  %v238_v1 = vmul.f32 %v817_v50, %v646_v12  ;;  %v239_v30 = vmul.f32 %v820_v51, %v620_v3  ;;  %v912_v12 = vld [vmem:[#allocation6 + $0x78] sm:$0xff] }
  0x4a   :  { %v194_v10 = vadd.f32 %v193_v6, %v192_v0  ;;  %v263_v2 = vmul.f32 %v884_v63, %v628_v5  ;;  %v264_v42 = vmul.f32 %v886_v16, %v654_v14  ;;  %v293_v43 = vmul.f32 %v888_v17, %v632_v7 }
  0x4b   :  { %v232_v44 = vadd.f32 %v230_v18, %v186_v28  ;;  %v150_v3 = vadd.f32 %v148_v29, %v104_v4  ;;  %v240_v45 = vadd.f32 %v239_v30, %v238_v1  ;;  %v294_v46 = vmul.f32 %v894_v19, %v656_v15 }
  0x4c   :  { %v265_v52 = vsub.f32 %v263_v2, %v264_v42  ;;  %v331_v53 = vmul.f32 %v900_v31, %v644_v11  ;;  %v332_v54 = vmul.f32 %v902_v34, %v669_v20  ;;  %v369_v55 = vmul.f32 %v904_v35, %v648_v13 }
  0x4d   :  { %255 = vst [vmem:[#allocation7 + $0x60] sm:$0xff] %v232_v44  ;;  %v196_v58 = vadd.f32 %v194_v10, %v150_v3  ;;  %v295_v59 = vsub.f32 %v293_v43, %v294_v46  ;;  %v370_v60 = vmul.f32 %v912_v12, %v672_v21  ;;  %v269_v62 = vmul.f32 %v884_v63, %v681_v24 }
  0x4e   :  { %v333_v18 = vsub.f32 %v331_v53, %v332_v54  ;;  %v270_v4 = vmul.f32 %v886_v16, %v697_v32  ;;  %v301_v0 = vmul.f32 %v888_v17, %v684_v25  ;;  %v302_v6 = vmul.f32 %v894_v19, %v700_v33 }
  0x4f   :  { %v242_v28 = vadd.f32 %v240_v45, %v196_v58  ;;  %v299_v29 = vadd.f32 %v295_v59, %v265_v52  ;;  %v371_v1 = vsub.f32 %v369_v55, %v370_v60  ;;  %v339_v30 = vmul.f32 %v900_v31, %v711_v37 }
  0x50   :  { %v271_v10 = vsub.f32 %v269_v62, %v270_v4  ;;  %v303_v2 = vsub.f32 %v301_v0, %v302_v6  ;;  %v340_v42 = vmul.f32 %v902_v34, %v720_v39  ;;  %v377_v43 = vmul.f32 %v904_v35, %v723_v40 }
  0x51   :  { %257 = vst [vmem:[#allocation7 + $0x70] sm:$0xff] %v242_v28  ;;  %v337_v44 = vadd.f32 %v333_v18, %v299_v29  ;;  %v378_v3 = vmul.f32 %v912_v12, %v726_v41  ;;  %v275_v45 = vmul.f32 %v884_v63, %v739_v48  ;;  %v276_v46 = vmul.f32 %v886_v16, %v742_v49 }
  0x52   :  { %v307_v52 = vadd.f32 %v303_v2, %v271_v10  ;;  %v341_v53 = vsub.f32 %v339_v30, %v340_v42  ;;  %v309_v54 = vmul.f32 %v888_v17, %v755_v56  ;;  %v310_v55 = vmul.f32 %v894_v19, %v758_v57 }
  0x53   :  { %v375_v58 = vadd.f32 %v371_v1, %v337_v44  ;;  %v379_v59 = vsub.f32 %v377_v43, %v378_v3  ;;  %v277_v60 = vsub.f32 %v275_v45, %v276_v46  ;;  %v347_v62 = vmul.f32 %v900_v31, %v769_v61 }
  0x54   :  { %v345_v18 = vadd.f32 %v341_v53, %v307_v52  ;;  %v311_v4 = vsub.f32 %v309_v54, %v310_v55  ;;  %v348_v0 = vmul.f32 %v902_v34, %v774_v8  ;;  %v385_v6 = vmul.f32 %v904_v35, %v777_v9 }
  0x55   :  { %402 = vst [vmem:[#allocation7 + $0x8] sm:$0xff] %v375_v58  ;;  %v386_v28 = vmul.f32 %v912_v12, %v784_v22  ;;  %v281_v29 = vmul.f32 %v884_v63, %v787_v23  ;;  %v282_v1 = vmul.f32 %v886_v16, %v790_v26  ;;  %v317_v30 = vmul.f32 %v888_v17, %v793_v27 }
  0x56   :  { %v383_v10 = vadd.f32 %v379_v59, %v345_v18  ;;  %v315_v2 = vadd.f32 %v311_v4, %v277_v60  ;;  %v349_v42 = vsub.f32 %v347_v62, %v348_v0  ;;  %v318_v43 = vmul.f32 %v894_v19, %v804_v36 }
  0x57   :  { %v387_v44 = vsub.f32 %v385_v6, %v386_v28  ;;  %v283_v3 = vsub.f32 %v281_v29, %v282_v1  ;;  %v355_v45 = vmul.f32 %v900_v31, %v807_v38  ;;  %v356_v46 = vmul.f32 %v902_v34, %v814_v47 }
  0x58   :  { %404 = vst [vmem:[#allocation7 + $0x18] sm:$0xff] %v383_v10  ;;  %v353_v52 = vadd.f32 %v349_v42, %v315_v2  ;;  %v319_v53 = vsub.f32 %v317_v30, %v318_v43  ;;  %v393_v54 = vmul.f32 %v904_v35, %v817_v50  ;;  %v394_v55 = vmul.f32 %v912_v12, %v820_v51 }
  0x59   :  { %v357_v58 = vsub.f32 %v355_v45, %v356_v46  ;;  %v266_v59 = vmul.f32 %v886_v16, %v628_v5  ;;  %v267_v60 = vmul.f32 %v884_v63, %v654_v14  ;;  %v296_v62 = vmul.f32 %v894_v19, %v632_v7 }
  0x5a   :  { %v391_v18 = vadd.f32 %v387_v44, %v353_v52  ;;  %v323_v4 = vadd.f32 %v319_v53, %v283_v3  ;;  %v395_v0 = vsub.f32 %v393_v54, %v394_v55  ;;  %v297_v6 = vmul.f32 %v888_v17, %v656_v15 }
  0x5b   :  { %v268_v28 = vadd.f32 %v267_v60, %v266_v59  ;;  %v334_v29 = vmul.f32 %v902_v34, %v644_v11  ;;  %v335_v1 = vmul.f32 %v900_v31, %v669_v20  ;;  %v372_v5 = vmul.f32 %v912_v12, %v648_v13 }
  0x5c   :  { %406 = vst [vmem:[#allocation7 + $0x28] sm:$0xff] %v391_v18  ;;  %v361_v14 = vadd.f32 %v357_v58, %v323_v4  ;;  %v298_v30 = vadd.f32 %v297_v6, %v296_v62  ;;  %v373_v7 = vmul.f32 %v904_v35, %v672_v21  ;;  %v272_v10 = vmul.f32 %v886_v16, %v681_v24 }
  0x5d   :  { %v336_v15 = vadd.f32 %v335_v1, %v334_v29  ;;  %v273_v2 = vmul.f32 %v884_v63, %v697_v32  ;;  %v304_v11 = vmul.f32 %v894_v19, %v684_v25  ;;  %v305_v20 = vmul.f32 %v888_v17, %v700_v33 }
  0x5e   :  { %v399_v13 = vadd.f32 %v395_v0, %v361_v14  ;;  %v300_v42 = vadd.f32 %v298_v30, %v268_v28  ;;  %v374_v43 = vadd.f32 %v373_v7, %v372_v5  ;;  %v342_v44 = vmul.f32 %v902_v34, %v711_v37 }
  0x5f   :  { %v274_v21 = vadd.f32 %v273_v2, %v272_v10  ;;  %v306_v3 = vadd.f32 %v305_v20, %v304_v11  ;;  %v343_v24 = vmul.f32 %v900_v31, %v720_v39  ;;  %v380_v32 = vmul.f32 %v912_v12, %v723_v40 }
  0x60   :  { %408 = vst [vmem:[#allocation7 + $0x38] sm:$0xff] %v399_v13  ;;  %v338_v45 = vadd.f32 %v336_v15, %v300_v42  ;;  %v381_v25 = vmul.f32 %v904_v35, %v726_v41  ;;  %v278_v33 = vmul.f32 %v886_v16, %v739_v48  ;;  %v279_v46 = vmul.f32 %v884_v63, %v742_v49 }
  0x61   :  { %v308_v37 = vadd.f32 %v306_v3, %v274_v21  ;;  %v344_v52 = vadd.f32 %v343_v24, %v342_v44  ;;  %v312_v53 = vmul.f32 %v894_v19, %v755_v56  ;;  %v313_v39 = vmul.f32 %v888_v17, %v758_v57 }
  0x62   :  { %v376_v40 = vadd.f32 %v374_v43, %v338_v45  ;;  %v382_v54 = vadd.f32 %v381_v25, %v380_v32  ;;  %v280_v55 = vadd.f32 %v279_v46, %v278_v33  ;;  %v350_v41 = vmul.f32 %v902_v34, %v769_v61 }
  0x63   :  { %v346_v58 = vadd.f32 %v344_v52, %v308_v37  ;;  %v314_v59 = vadd.f32 %v313_v39, %v312_v53  ;;  %v351_v48 = vmul.f32 %v900_v31, %v774_v8  ;;  %v388_v49 = vmul.f32 %v912_v12, %v777_v9 }
  0x64   :  { %410 = vst [vmem:[#allocation7 + $0x48] sm:$0xff] %v376_v40  ;;  %v389_v56 = vmul.f32 %v904_v35, %v784_v22  ;;  %v284_v57 = vmul.f32 %v886_v16, %v787_v23  ;;  %v285_v60 = vmul.f32 %v884_v63, %v790_v26  ;;  %v320_v61 = vmul.f32 %v894_v19, %v793_v27 }
  0x65   :  { %v384_v62 = vadd.f32 %v382_v54, %v346_v58  ;;  %v316_v18 = vadd.f32 %v314_v59, %v280_v55  ;;  %v352_v4 = vadd.f32 %v351_v48, %v350_v41  ;;  %v321_v8 = vmul.f32 %v888_v17, %v804_v36 }
  0x66   :  { %v390_v9 = vadd.f32 %v389_v56, %v388_v49  ;;  %v286_v0 = vadd.f32 %v285_v60, %v284_v57  ;;  %v358_v22 = vmul.f32 %v902_v34, %v807_v38  ;;  %v359_v23 = vmul.f32 %v900_v31, %v814_v47 }
  0x67   :  { %412 = vst [vmem:[#allocation7 + $0x58] sm:$0xff] %v384_v62  ;;  %v354_v16 = vadd.f32 %v352_v4, %v316_v18  ;;  %v322_v26 = vadd.f32 %v321_v8, %v320_v61  ;;  %v396_v27 = vmul.f32 %v912_v12, %v817_v50  ;;  %v397_v63 = vmul.f32 %v904_v35, %v820_v51 }
  0x68   :  { %v360_v19 = vadd.f32 %v359_v23, %v358_v22 }
  0x69   :  { %v392_v6 = vadd.f32 %v390_v9, %v354_v16  ;;  %v324_v36 = vadd.f32 %v322_v26, %v286_v0  ;;  %v398_v17 = vadd.f32 %v397_v63, %v396_v27 }
  0x6b   :  { %414 = vst [vmem:[#allocation7 + $0x68] sm:$0xff] %v392_v6  ;;  %v362_v38 = vadd.f32 %v360_v19, %v324_v36 }
  0x6d   :  { %v400_v34 = vadd.f32 %v398_v17, %v362_v38 }
  0x6f   :  { %416 = vst [vmem:[#allocation7 + $0x78] sm:$0xff] %v400_v34 }
  0x70   :  { %542 = shalt.err (!%p539_p1)
}
  0x71   :  { %s543_s12 = scalar_lea.hbm %s1053_s2, 2048 }
  0x72   :  { %p544_p2 = scmp.ne.s32.totalorder %s1053_s2, %s543_s12  ;;  %p547_p3 = scmp.lt.u32.totalorder %s543_s12, %s1053_s2 }
  0x74   :  { %p549_p4 = pnand %p547_p3, %p544_p2 }
  0x76   :  { %552 = shalt.err (!%p549_p4)
}
  0x77   :  { %428 = dma.vmem_to_hbm [thread:$0]  %s423_s9, 2048, %s1053_s2, [#allocation4], %s561_s0, %s561_s0, %s562_s29  }
  0x78   :  { %557 = dma.done.wait [#allocation4], 2048  }
  0x79   :  { %558 = vsyncadd [#allocation4], 4294965248 }
  0x7a   :  { %432 = vsyncpa [#allocation3], 1 }
  0x7b   :  { %433 = vsyncpa [#allocation4], 1 }
  0x7c   :  { %434 = vsyncpa [#allocation5], 1 }

</bundles_post_ra>
